<compile_context>
chip_gen: v5e
topology: v5e:2x2
jax: 0.10.0
libtpu: 0.0.40
codegen_flags: <defaults>
</compile_context>

<pallas_src>
import math
from functools import partial

import jax
import jax.numpy as jnp
from jax.experimental import pallas as pl
from jax.experimental.pallas import tpu as pltpu


def _vmem_limit_bytes():
    """Generation-aware scoped-VMEM limit (~3/4 of physical capacity)."""
    try:
        cap = getattr(pltpu.get_tpu_info(), "vmem_capacity_bytes", None)
        if cap:
            return int(cap) * 3 // 4
    except Exception:
        pass
    return 48 * 1024 * 1024  # safe fallback: fits v7x's 64 MiB with headroom


# ---------------------------------------------------------------------------
# Kernel 1: projected memory, emitted pre-transposed.
#   kT[b, :, tile] = relu(memory[b, tile, :] @ wt).T        (bf16 output)
# ---------------------------------------------------------------------------
def _mem_proj_t_kernel(mem_ref, wt_ref, o_ref):
    y = jnp.dot(mem_ref[0].astype(jnp.bfloat16), wt_ref[...],
                preferred_element_type=jnp.float32)          # (TLM, A), f32 accum
    # One transpose per memory tile here, hoisted out of the attention inner loop.
    o_ref[0] = jnp.maximum(y, 0.0).T.astype(o_ref.dtype)     # (A, TLM)


def memory_proj_transposed(memory, wt_bf16, *, tlm=512):
    """relu(memory @ wt), returned transposed as (B, A, Lm) in bf16."""
    B, Lm, H = memory.shape
    A = wt_bf16.shape[1]
    TLM = Lm if Lm <= tlm else tlm   # multiple of 256 -> MXU M-dim aligned tiles
    # TODO(synk): add a K (H) reduction grid axis + f32 VMEM accumulator when H
    # is too large for whole rows of the weight/activation to sit in VMEM.
    return pl.pallas_call(
        _mem_proj_t_kernel,
        out_shape=jax.ShapeDtypeStruct((B, A, Lm), jnp.bfloat16),
        grid=(B, pl.cdiv(Lm, TLM)),
        in_specs=[
            pl.BlockSpec((1, TLM, H), lambda b, mi: (b, mi, 0)),
            # Same block every step -> weight stays resident in VMEM across the grid.
            pl.BlockSpec((H, A), lambda b, mi: (0, 0)),
        ],
        out_specs=pl.BlockSpec((1, A, TLM), lambda b, mi: (b, 0, mi)),
        compiler_params=pltpu.CompilerParams(
            dimension_semantics=("parallel", "parallel"),
            vmem_limit_bytes=_vmem_limit_bytes(),
        ),
        cost_estimate=pl.CostEstimate(
            flops=2 * B * Lm * H * A,
            transcendentals=0,
            bytes_accessed=B * Lm * H * memory.dtype.itemsize + H * A * 2 + B * A * Lm * 2,
        ),
    )(memory, wt_bf16)


# ---------------------------------------------------------------------------
# Kernel 2: fused input projection + masked dot attention + output "concat",
# per (batch, query-tile).
# ---------------------------------------------------------------------------
def _attention_kernel(inp_ref, wt_ref, kt_ref, mem_ref, mask_ref, o_ref, *,
                      scale, eps, hm):
    inp = inp_ref[0]                                          # (TQ, H)  f32
    # Fused shared projection of the query rows (weight resident in VMEM);
    # 1/sqrt(A) folded into the small (TQ, A) tile, not the (TQ, Lm) logits.
    q = jnp.dot(inp.astype(jnp.bfloat16), wt_ref[...],
                preferred_element_type=jnp.float32)           # (TQ, A) f32 accum
    q = jnp.maximum(q, 0.0) * scale

    # K was emitted pre-transposed as (A, Lm): plain sublane-contracting dot,
    # no XLU transpose in this inner loop.
    logits = jnp.dot(q.astype(jnp.bfloat16), kt_ref[0],
                     preferred_element_type=jnp.float32)      # (TQ, Lm)

    # masked_softmax with multiplicative mask (faithful to the PyTorch module),
    # two normalizations fused into one reciprocal:
    #   p = e*m / (sum(e*m) + eps*sum(e))  ==  (e/S)*m / (sum((e/S)*m) + eps)
    m = mask_ref[0].astype(jnp.float32)                       # (1, Lm) -> broadcasts
    z = logits * m
    e = jnp.exp(z - jnp.max(z, axis=-1, keepdims=True))
    em = e * m
    denom = (jnp.sum(em, axis=-1, keepdims=True)
             + eps * jnp.sum(e, axis=-1, keepdims=True))
    p = em * pl.reciprocal(denom, approx=True)                # (TQ, Lm)

    ctx = jnp.dot(p.astype(jnp.bfloat16), mem_ref[0].astype(jnp.bfloat16),
                  preferred_element_type=jnp.float32)         # (TQ, Hm) f32 accum

    # concat([context, input], -1) as two direct sub-slice stores — no in-kernel
    # concatenate value / extra vreg shuffles.
    o_ref[0, :, :hm] = ctx.astype(o_ref.dtype)
    o_ref[0, :, hm:] = inp.astype(o_ref.dtype)


def static_dot_attention_forward(inputs, memory, memory_mask, wt, attention_size,
                                 *, tq=256, tlm=512):
    """Inference forward of StaticDotAttention (batch_first=True, dropout=identity).

    inputs      : (B, Li, H)   float32
    memory      : (B, Lm, Hm)  float32   (module requires Hm == input_size)
    memory_mask : (B, Lm) in {0, 1}
    wt          : (H, A) pre-transposed Linear weight (transpose once at load time)
    returns     : (B, Li, Hm + H) = concat([context, inputs], -1)
    """
    # TODO(synk): training-mode RNNDropout (shared per-sequence dropout mask) not applied.
    # TODO(synk): batch_first=False path (plain transposes in the wrapper) not implemented.
    B, Li, H = inputs.shape
    _, Lm, Hm = memory.shape
    A = wt.shape[1]

    # bf16 weight for the MXU (tiny H*A cast, once per call).
    wt_bf16 = wt.astype(jnp.bfloat16)

    # Kernel 1: projected memory, pre-transposed to (B, A, Lm), bf16.
    kT = memory_proj_transposed(memory, wt_bf16, tlm=tlm)

    mask3 = memory_mask.reshape(B, 1, Lm).astype(jnp.float32)
    TQ = Li if Li <= tq else tq          # multiple of 256 -> MXU-aligned M dim
    scale = 1.0 / math.sqrt(attention_size)
    out_w = Hm + H
    f32b = inputs.dtype.itemsize

    # NOTE: whole-memory blocks stay resident per batch; their index_maps are
    # constant in qi so Pallas does not re-fetch them across query tiles.  On
    # v7x they could additionally be single-buffered (pipeline_mode=pl.Buffered(1))
    # to halve resident VMEM.
    # TODO(synk): flash-style Lm-streaming grid axis (online-softmax m/l/acc in
    # VMEM scratch) for memories too large to keep resident in v7x's 64 MiB VMEM.
    return pl.pallas_call(
        partial(_attention_kernel, scale=scale, eps=1e-13, hm=Hm),
        out_shape=jax.ShapeDtypeStruct((B, Li, out_w), inputs.dtype),
        # Megacore: B is the leading grid axis so the core split lands on the
        # axis that does NOT duplicate the per-batch resident (Lm, *) DMAs.
        grid=(B, pl.cdiv(Li, TQ)),
        in_specs=[
            pl.BlockSpec((1, TQ, H), lambda b, qi: (b, qi, 0)),    # raw input rows
            pl.BlockSpec((H, A), lambda b, qi: (0, 0)),            # resident weight (bf16)
            pl.BlockSpec((1, A, Lm), lambda b, qi: (b, 0, 0)),     # projected memory^T (bf16)
            pl.BlockSpec((1, Lm, Hm), lambda b, qi: (b, 0, 0)),    # raw memory
            pl.BlockSpec((1, 1, Lm), lambda b, qi: (b, 0, 0)),     # mask
        ],
        out_specs=pl.BlockSpec((1, TQ, out_w), lambda b, qi: (b, qi, 0)),
        compiler_params=pltpu.CompilerParams(
            dimension_semantics=("parallel", "parallel"),
            vmem_limit_bytes=_vmem_limit_bytes(),
        ),
        cost_estimate=pl.CostEstimate(
            flops=2 * B * Li * (H * A + A * Lm + Lm * Hm),
            transcendentals=B * Li * Lm,
            bytes_accessed=(B * Li * H + B * Lm * Hm + B * Lm + B * Li * out_w) * f32b
                           + (H * A + B * A * Lm) * 2,
        ),
    )(inputs, wt_bf16, kT, memory, mask3)


if __name__ == "__main__":
    # Small shapes consistent with the module: batch=2, seq=8, hidden=32, attention=32.
    batch, seq_in, seq_mem, hidden, att = 2, 8, 8, 32, 32
    key = jax.random.PRNGKey(0)
    k1, k2, k3 = jax.random.split(key, 3)

    x = jax.random.normal(k1, (batch, seq_in, hidden), dtype=jnp.float32)
    mem = jax.random.normal(k2, (batch, seq_mem, hidden), dtype=jnp.float32)

    # PyTorch-style Linear weight (out=att, in=hidden); transpose ONCE at setup.
    bound = 1.0 / math.sqrt(hidden)
    w = jax.random.uniform(k3, (att, hidden), dtype=jnp.float32,
                           minval=-bound, maxval=bound)
    wt = jnp.asarray(w).T                                   # (hidden, att)

    # memory mask: batch 0 attends to all 8 slots, batch 1 only to the first 5.
    lens = jnp.array([8, 5])
    mask = (jnp.arange(seq_mem)[None, :] < lens[:, None]).astype(jnp.float32)

    out = static_dot_attention_forward(x, mem, mask, wt, att)
    out = jax.block_until_ready(out)

    # Pure-JAX f32 reference (inference mode: dropout is identity).
    def ref_forward(x, mem, mask, wt, att):
        inp_p = jax.nn.relu(jnp.einsum("bsh,ha->bsa", x, wt))
        mem_p = jax.nn.relu(jnp.einsum("bsh,ha->bsa", mem, wt))
        scale = 1.0 / math.sqrt(att)
        logits = jnp.einsum("bqa,bka->bqk", inp_p, mem_p) * scale
        m = mask[:, None, :]
        z = logits * m
        e = jnp.exp(z - z.max(-1, keepdims=True))
        p = e / e.sum(-1, keepdims=True)
        p = p * m
        p = p / (p.sum(-1, keepdims=True) + 1e-13)
        ctx = jnp.einsum("bqk,bkh->bqh", p, mem)
        return jnp.concatenate([ctx, x], axis=-1)

    ref = ref_forward(x, mem, mask, wt, att)
    assert out.shape == (batch, seq_in, 2 * hidden)
    # bf16 MXU inputs + approx EUP reciprocal -> relaxed tolerance vs f32 reference.
    assert jnp.allclose(out, ref, atol=2e-2, rtol=2e-2), "mismatch vs reference"
    print("KERNEL_OK")
</pallas_src>

<mosaic_0001>
module attributes {stable_mosaic.version = 11 : i64} {
  func.func @_mem_proj_t_kernel(%arg0: i32, %arg1: i32, %arg2: memref<1x8x32xf32, #tpu.memory_space<vmem>>, %arg3: memref<32x32xbf16, #tpu.memory_space<vmem>>, %arg4: memref<1x32x8xbf16, #tpu.memory_space<vmem>>) attributes {dimension_semantics = [#tpu.dimension_semantics<parallel>, #tpu.dimension_semantics<parallel>], iteration_bounds = array<i64: 2, 1>, scalar_prefetch = 0 : i64, scratch_operands = 0 : i64, tpu.core_type = #tpu.core_type<tc>, window_params = [{transform_indices = @transform_0, window_bounds = array<i64: 1, 8, 32>}, {pipeline_mode = #tpu.pipeline_mode<synchronous>, transform_indices = @transform_1, window_bounds = array<i64: 32, 32>}, {transform_indices = @transform_2, window_bounds = array<i64: 1, 32, 8>}]} {
    %c0 = arith.constant 0 : index
    %c0_0 = arith.constant 0 : index
    %c0_1 = arith.constant 0 : index
    %0 = vector.load %arg2[%c0, %c0_0, %c0_1] : memref<1x8x32xf32, #tpu.memory_space<vmem>>, vector<1x8x32xf32>
    %1 = vector.shape_cast %0 : vector<1x8x32xf32> to vector<8x32xf32>
    %2 = arith.truncf %1 : vector<8x32xf32> to vector<8x32xbf16>
    %c0_2 = arith.constant 0 : index
    %c0_3 = arith.constant 0 : index
    %3 = vector.load %arg3[%c0_2, %c0_3] : memref<32x32xbf16, #tpu.memory_space<vmem>>, vector<32x32xbf16>
    %cst = arith.constant dense<0.000000e+00> : vector<8x32xf32>
    %4 = tpu.matmul %2, %3, %cst {dimension_numbers = #tpu.dot_dimension_numbers<[1], [0], [0], [1], [0, 0, 1, 1], [], []>} : vector<8x32xbf16>, vector<32x32xbf16>, vector<8x32xf32> -> vector<8x32xf32>
    %cst_4 = arith.constant 0.000000e+00 : f32
    %5 = vector.broadcast %cst_4 : f32 to vector<8x32xf32>
    %6 = arith.maximumf %4, %5 : vector<8x32xf32>
    %7 = tpu.transpose %6, [1, 0] : vector<8x32xf32> -> vector<32x8xf32>
    %8 = arith.truncf %7 : vector<32x8xf32> to vector<32x8xbf16>
    %c0_5 = arith.constant 0 : index
    %c0_6 = arith.constant 0 : index
    %c0_7 = arith.constant 0 : index
    %9 = vector.load %arg4[%c0_5, %c0_6, %c0_7] : memref<1x32x8xbf16, #tpu.memory_space<vmem>>, vector<1x32x8xbf16>
    %10 = vector.shape_cast %9 : vector<1x32x8xbf16> to vector<32x8xbf16>
    %11 = vector.shape_cast %8 : vector<32x8xbf16> to vector<1x32x8xbf16>
    tpu.vector_store %arg4[%c0_5, %c0_6, %c0_7], %11 {strides = array<i32>} : memref<1x32x8xbf16, #tpu.memory_space<vmem>>, vector<1x32x8xbf16>,
    return
  }
  func.func @transform_0(%arg0: i32, %arg1: i32) -> (i32, i32, i32) {
    %c0_i32 = arith.constant 0 : i32
    %c0_i32_0 = arith.constant 0 : i32
    return %arg0, %arg1, %c0_i32 : i32, i32, i32
  }
  func.func @transform_1(%arg0: i32, %arg1: i32) -> (i32, i32) {
    %c0_i32 = arith.constant 0 : i32
    %c0_i32_0 = arith.constant 0 : i32
    %c0_i32_1 = arith.constant 0 : i32
    return %c0_i32, %c0_i32_0 : i32, i32
  }
  func.func @transform_2(%arg0: i32, %arg1: i32) -> (i32, i32, i32) {
    %c0_i32 = arith.constant 0 : i32
    %c0_i32_0 = arith.constant 0 : i32
    return %arg0, %c0_i32, %arg1 : i32, i32, i32
  }
}

</mosaic_0001>

<bundles_post_ra>
// kernel: tpu_custom_call.1
= control target key start
LH: loop header
LB: loop body
LE: loop exit
PB: predicated region body
PF: predicated region fallthrough
CT: control target
= control target key end

     0   :  { %7 = vsyncpa [#allocation3], 0  ;;  %s724_s0 = inlined_call_operand.hbm [shape: f32[2,8,32], index: 0, kind: input, shape index: {}]   ;;  %s725_s1 = inlined_call_operand.hbm [shape: bf16[32,32], index: 1, kind: input, shape index: {}]   ;;  %s726_s2 = inlined_call_operand.vmem [shape: bf16[2,32,8], index: 2, kind: output, shape index: {}]  }
   0x1   :  { %9 = vsyncpa [#allocation3 + $0x1], 0 }
   0x2   :  { %10 = vsyncpa [#allocation5], 0  ;;  %s610_s9 = smov 0   ;;  %s612_s10 = smov 0  }
   0x3   :  { %s614_s11 = smov 0   ;;  %s616_s12 = smov 0  }
   0x4   :  { %s618_s13 = smov 0   ;;  %s620_s14 = smov 0  }
   0x5 LB: > { %s381_s15 = sadd.s32 4294967295, %s590_s14   ;;  %p383_p0 = scmp.ge.s32.totalorder %s590_s14, 1  ;;  %s590_s14 = sphi %s620_s14, %s16_s14   ;;  %s586_s13 = sphi %s618_s13, %s735_s13   ;;  %s582_s12 = sphi %s616_s12, %s734_s12   ;;  %s578_s11 = sphi %s614_s11, %s733_s11   ;;  %s574_s10 = sphi %s612_s10, %s732_s10   ;;  %s570_s9 = sphi %s610_s9, %s731_s9  }
   0x6   : > { %p642_p1 = scmp.eq.s32.totalorder %s381_s15, 0  ;;  %p110_p2 = scmp.lt.s32.totalorder %s590_s14, 3 }
   0x7   : > { %s121_s19 = sshll.u32 %s725_s1, 4  ;;  %s592_s21 = smov [#allocation4]   ;;  %s122_s19 = int_to_ptr.hbm [resolvable:$true] %s121_s19 }
   0x8   : > { %p650_p3 = pnand %p383_p0, %p110_p2  ;;  %s123_s22 = sshll.u32 %s592_s21, 4  ;;  %s124_s22 = int_to_ptr.vmem [resolvable:$true] %s123_s22 }
   0x9   : > { %s593_s23 = smov 64   ;;  %s594_s24 = smov 4  }
   0xa   : > { %p413_p4 = pneg %p650_p3  ;;  %s28_s25 = sadd.s32 1, %s586_s13 }
   0xb   : > { %p30_p6 = scmp.ge.s32.totalorder %s28_s25, 2  ;;  %p44_p7 = scmp.ne.s32.totalorder %s578_s11, %s574_s10 }
   0xc   : > { %p414_p5 = pnand %p413_p4, %p642_p1  ;;  %p45_p8 = scmp.eq.s32.totalorder %s590_s14, 0 }
   0xd   : > { %s737_s25 = smov (%p30_p6, %s28_s25), 0  ;;  %s37_s26 = sadd.s32 1, %s578_s11 }
   0xe   : > { %416 = dma.hbm_to_vmem [thread:$0]  (!%p414_p5), %s122_s19, 256, %s124_s22, [#allocation5], %s593_s23, %s593_s23, %s594_s24  }
   0xf   : > { %p50_p9 = scmp.ne.s32.totalorder %s574_s10, %s570_s9  ;;  %s32_s27 = ssub.s32 %s586_s13, %s737_s25 }
  0x10   : > { %p669_p10 = por %p45_p8, %p44_p7  ;;  %p35_p11 = scmp.eq.s32.totalorder %s32_s27, 0 }
  0x11   : > { %p675_p12 = por %p642_p1, %p50_p9  ;;  %s137_s30 = sand.u32 1, %s578_s11  }
  0x12   : > { %s387_s3 = sshll.u32 %s586_s13, 3  ;;  %p422_p13 = scmp.lt.s32.totalorder %s590_s14, 2 }
  0x13   : > { %s682_s4 = scalar_select %p35_p11, %s578_s11, %s37_s26  }
  0x14   : > { %s386_s5 = sshll.u32 %s137_s30, 3  ;;  %s146_s8 = scalar_lea.hbm %s724_s0, %s387_s3 }
  0x15   : > { %s148_s9 = sshll.u32 %s146_s8, 4  ;;  %s141_s15 = scalar_lea.vmem [#allocation2], %s386_s5  ;;  %s149_s9 = int_to_ptr.hbm [resolvable:$true] %s148_s9 }
  0x16   : > { %s150_s17 = sshll.u32 %s141_s15, 4  ;;  %p418_p0 = pnand %p422_p13, %p669_p10  ;;  %s151_s17 = int_to_ptr.vmem [resolvable:$true] %s150_s17 }
  0x17   : > { %s138_s18 = scalar_lea.sflag [#allocation3], %s137_s30  ;;  %159 = sbr.rel (%p650_p3) target bundleno = 359 (0x167), region = 28 }
  0x18   : > { %420 = dma.hbm_to_vmem [thread:$0]  (!%p418_p0), %s149_s9, 128, %s151_s17, %s138_s18  }
  0x19   : > { %s161_s19 = sand.u32 (!%p650_p3), 1, %s574_s10  }
  0x1a   : > { %s389_s21 = sshll.u32 (!%p650_p3), %s161_s19, 3  ;;  %s162_s22 = scalar_lea.sflag (!%p650_p3), [#allocation3], %s161_s19 }
  0x1b   : > { %s165_s23 = scalar_lea.vmem (!%p650_p3), [#allocation2], %s389_s21 }
  0x1c   : > { %561 = dma.done.wait (%p675_p12), %s162_s22, 128  }
  0x1d   : > { %563 = vsyncadd (%p675_p12), %s162_s22, 4294967168 }
  0x1e   : > { %565 = dma.done.wait (%p642_p1), [#allocation5], 256  }
  0x1f   : > { %567 = vsyncadd (%p642_p1), [#allocation5], 4294967040  ;;  %v406_v0 = vld [vmem:[#allocation4 + $0x8] sm:$0xff]  ;;  %v405_v1 = vld [vmem:[#allocation4] sm:$0xff]  ;;  %vm222_vm0 = vcmask 261120   ;;  %p195_p2 = scmp.lt.s32.totalorder %s582_s12, 1 }
  0x20   : > { %232 = vmatpush.bf16.msra.mxu0 %v406_v0  ;;  %v204_v2 = vld [vmem:[%s165_s23] sm:$0xff]  ;;  %vm276_vm1 = vcmask 60416  }
  0x21   : > { %v205_v3 = vpack.c.bf16 %v204_v2, %v204_v2  ;;  %s739_s12 = smov (!%p195_p2, %s582_s12), 1 }
  0x22   : > { %s404_s20 = sshll.u32 %s739_s12, 4 }
  0x23   : > { %s202_s26 = scalar_lea.vmem %s726_s2, %s404_s20 }
  0x24   : > { %233 = vmatpush.bf16.msra.mxu0 %v405_v1 }
  0x27   : > { %401 = vmatmul.msk.bf16.vlgmr.msra.gmra.mxu0 %vm222_vm0, %v205_v3 }
  0xa4   : > { %v235_v4 = vpop.f32.mrf.mxu0 }
  0xa5   : > { %v239_v5 = vmax.f32 %v235_v4, 0.0 }
  0xa7   : > { %240 = vxpose.xlu0.b32.start.end [1/1] (short) (narrow) %v239_v5, 32 }
  0xac   : > { %v237_v6 = vpop.f32.mrf.mxu0 }
 0x14b   : > { %v256_v7 = vpop.trf.xlu0 }
 0x14c   : > { %v272_v8 = vpack.c.bf16 %v256_v7, %v256_v7 }
 0x14e   : > { %277 = vst.msk [vmem:[%s202_s26] sm:$0xf] %vm276_vm1, %v272_v8 }
 0x153   : > { %v257_v9 = vpop.trf.xlu0 }
 0x154   : > { %v273_v10 = vpack.c.bf16 %v257_v9, %v257_v9 }
 0x156   : > { %278 = vst.msk [vmem:[%s202_s26 + $0x4] sm:$0xf] %vm276_vm1, %v273_v10 }
 0x15b   : > { %v258_v11 = vpop.trf.xlu0 }
 0x15c   : > { %v274_v12 = vpack.c.bf16 %v258_v11, %v258_v11 }
 0x15e   : > { %279 = vst.msk [vmem:[%s202_s26 + $0x8] sm:$0xf] %vm276_vm1, %v274_v12 }
 0x163   : > { %v259_v13 = vpop.trf.xlu0 }
 0x164   : > { %v275_v14 = vpack.c.bf16 %v259_v13, %v259_v13 }
 0x166   : > { %280 = vst.msk [vmem:[%s202_s26 + $0xc] sm:$0xf] %vm276_vm1, %v275_v14 }
 0x167 PF: > { %s16_s14 = sadd.s32 1, %s590_s14   ;;  %s731_s9 = smov %s574_s10 }
 0x168   : > { %p13_p1 = scmp.ge.s32.totalorder %s16_s14, 4   ;;  %s732_s10 = smov %s578_s11 }
 0x169   : > { %s733_s11 = smov %s682_s4  ;;  %s734_s12 = smov %s586_s13 }
 0x16a   : > { %s735_s13 = smov %s737_s25  ;;  %15 = sbr.rel (!%p13_p1) target bundleno = 5 (0x5), region = 72 }
 0x16f   :  { %308 = vsyncpa [#allocation3], 1 }
 0x170   :  { %310 = vsyncpa [#allocation3 + $0x1], 1 }
 0x171   :  { %311 = vsyncpa [#allocation5], 1 }

</bundles_post_ra>
